<compile_context>
chip_gen: v5e
topology: v5e:2x2
jax: 0.10.0
libtpu: 0.0.40
codegen_flags: <defaults>
</compile_context>

<pallas_src>
import jax
import jax.numpy as jnp
from jax.experimental import pallas as pl
from jax.experimental.pallas import tpu as pltpu


def _copy_kernel(x_ref, o_ref):
    # Lane-dense 2-D tile copy; the 4-D reshape happens (for free) in the wrapper.
    o_ref[...] = x_ref[...]


def _round_up(x, m):
    return ((x + m - 1) // m) * m


def _target_block_bytes():
    """Per-generation per-block byte budget (before double-buffering)."""
    try:
        kind = jax.devices()[0].device_kind.lower()
    except Exception:
        kind = ""
    # v5e HBM ~0.82 TB/s: 2 MiB blocks already put DMA time >> step overhead and
    # keep the 4x double-buffered footprint small.
    # v6e/v7x HBM 1.4-3.2 TB/s: ~4 MiB blocks are needed to amortize the
    # ~0.35 us per-grid-step overhead; 4 buffers = 16 MiB, well inside v7x's
    # 64 MiB physical VMEM once vmem_limit_bytes is raised explicitly.
    if "v5 lite" in kind or "v5e" in kind or "v5lite" in kind:
        return 2 * 1024 * 1024
    return 4 * 1024 * 1024


def _pick_tiles(b, flat, itemsize, target_block_bytes):
    """Fixed (multiple-of-8, multiple-of-128) tile; Pallas masks ragged last blocks."""
    # Lane (last) axis: large multiple of 128 (unmasked, lane-dense stores for all
    # full blocks), but capped so the lane axis still splits into multiple grid
    # steps for mid/large inputs (keeps both v7x TCs busy, overlaps DMA in/out).
    tf = min(_round_up(flat, 128), 8192)
    # Sublane axis: as many multiple-of-8 rows as fit the per-block budget.
    tb = max(8, target_block_bytes // (tf * itemsize))
    tb = (tb // 8) * 8
    tb = min(tb, _round_up(b, 8))
    return int(tb), int(tf)


def unflatten(x, output_channels, width, height, *, use_pallas=True):
    """Pallas equivalent of UnFlatten.forward.

    x: (B, output_channels * width * height)  ->  (B, C, W, H)

    NOTE: the cheapest correct implementation is `x.reshape(...)` with no kernel
    at all (use_pallas=False).  The Pallas path is an explicit tiled copy kept
    for cases where a kernel must exist (e.g. fused with surrounding work).
    """
    b, flat = x.shape
    assert flat == output_channels * width * height, (
        f"flat dim {flat} != {output_channels}*{width}*{height}"
    )
    out_shape_4d = (b, output_channels, width, height)

    if not use_pallas:
        # Metadata-only; identical element order to torch .view.
        return x.reshape(out_shape_4d)

    itemsize = jnp.dtype(x.dtype).itemsize
    tb, tf = _pick_tiles(b, flat, itemsize, _target_block_bytes())
    grid = (pl.cdiv(b, tb), pl.cdiv(flat, tf))

    # Explicit scoped-VMEM budget: 2 input + 2 output double-buffers + ~25%
    # headroom, clamped to a range valid on every generation (v7x physical VMEM
    # per TC is 64 MiB).
    block_bytes = tb * tf * itemsize
    vmem_limit = int(4 * block_bytes * 1.25)
    vmem_limit = max(vmem_limit, 8 * 1024 * 1024)
    vmem_limit = min(vmem_limit, 48 * 1024 * 1024)

    y2d = pl.pallas_call(
        _copy_kernel,
        out_shape=jax.ShapeDtypeStruct((b, flat), x.dtype),
        grid=grid,
        in_specs=[pl.BlockSpec((tb, tf), lambda i, j: (i, j))],
        out_specs=pl.BlockSpec((tb, tf), lambda i, j: (i, j)),
        compiler_params=pltpu.CompilerParams(
            dimension_semantics=("parallel", "parallel"),
            vmem_limit_bytes=vmem_limit,
        ),
        cost_estimate=pl.CostEstimate(
            flops=0,
            transcendentals=0,
            bytes_accessed=2 * b * flat * itemsize,
        ),
    )(x)

    # Free, metadata-only reshape to NCHW — same row-major element order as
    # torch.Tensor.view(B, C, W, H).
    return y2d.reshape(out_shape_4d)


if __name__ == "__main__":
    key = jax.random.PRNGKey(0)

    # Shapes implied by the module: input (B, C*W*H) -> output (B, C, W, H).
    B, C, W, H = 2, 4, 16, 16
    x = jax.random.normal(key, (B, C * W * H), dtype=jnp.float32)

    y = jax.block_until_ready(unflatten(x, C, W, H))
    ref = x.reshape(B, C, W, H)   # torch .view semantics: row-major reshape
    assert y.shape == (B, C, W, H), y.shape
    assert y.dtype == x.dtype
    assert jnp.array_equal(y, ref), "mismatch vs reference reshape"

    # Unaligned case (b % 8 != 0, flat % 128 != 0): exercises the ragged-block
    # masking that replaced the old full-extent fallback.
    B2, C2, W2, H2 = 3, 3, 7, 9
    x2 = jax.random.normal(jax.random.PRNGKey(0), (B2, C2 * W2 * H2), dtype=jnp.float32)
    y2 = jax.block_until_ready(unflatten(x2, C2, W2, H2))
    assert jnp.array_equal(y2, x2.reshape(B2, C2, W2, H2)), "unaligned mismatch"

    # Zero-cost path (the recommended production implementation) also checked.
    y_free = unflatten(x, C, W, H, use_pallas=False)
    assert jnp.array_equal(y_free, ref)

    print("KERNEL_OK")
</pallas_src>

<mosaic_0001>
module attributes {stable_mosaic.version = 11 : i64} {
  func.func @_copy_kernel(%arg0: i32, %arg1: i32, %arg2: memref<8x1024xf32, #tpu.memory_space<vmem>>, %arg3: memref<8x1024xf32, #tpu.memory_space<vmem>>) attributes {dimension_semantics = [#tpu.dimension_semantics<parallel>, #tpu.dimension_semantics<parallel>], iteration_bounds = array<i64: 1, 1>, scalar_prefetch = 0 : i64, scratch_operands = 0 : i64, tpu.core_type = #tpu.core_type<tc>, window_params = [{transform_indices = @transform_0, window_bounds = array<i64: 8, 1024>}, {transform_indices = @transform_1, window_bounds = array<i64: 8, 1024>}]} {
    %c0 = arith.constant 0 : index
    %c0_0 = arith.constant 0 : index
    %0 = vector.load %arg2[%c0, %c0_0] : memref<8x1024xf32, #tpu.memory_space<vmem>>, vector<8x1024xf32>
    %c0_1 = arith.constant 0 : index
    %c0_2 = arith.constant 0 : index
    %1 = vector.load %arg3[%c0_1, %c0_2] : memref<8x1024xf32, #tpu.memory_space<vmem>>, vector<8x1024xf32>
    tpu.vector_store %arg3[%c0_1, %c0_2], %0 {strides = array<i32>} : memref<8x1024xf32, #tpu.memory_space<vmem>>, vector<8x1024xf32>,
    return
  }
  func.func @transform_0(%arg0: i32, %arg1: i32) -> (i32, i32) {
    %c0_i32 = arith.constant 0 : i32
    return %arg0, %arg1 : i32, i32
  }
  func.func @transform_1(%arg0: i32, %arg1: i32) -> (i32, i32) {
    %c0_i32 = arith.constant 0 : i32
    return %arg0, %arg1 : i32, i32
  }
}

</mosaic_0001>

<bundles_post_ra>
// kernel: tpu_custom_call.1
= control target key start
LH: loop header
LB: loop body
LE: loop exit
PB: predicated region body
PF: predicated region fallthrough
CT: control target
= control target key end

     0   :  { %6 = vsyncpa [#allocation3], 0  ;;  %s142_s0 = inlined_call_operand.hbm [shape: f32[2,1024], index: 0, kind: input, shape index: {}]   ;;  %s143_s1 = inlined_call_operand.hbm [shape: f32[2,1024], index: 1, kind: output, shape index: {}]  }
   0x1   :  { %7 = vsyncpa [#allocation4], 0 }
   0x2   :  { %11 = vsyncadd [#allocation3], 768  ;;  %s12_s8 = sshll.u32 %s142_s0, 4  ;;  %s116_s9 = smov [#allocation2]   ;;  %s13_s8 = int_to_ptr.hbm [resolvable:$true] %s12_s8 }
   0x3   :  { %s14_s10 = sshll.u32 %s116_s9, 4  ;;  %s117_s11 = smov 256   ;;  %s15_s10 = int_to_ptr.vmem [resolvable:$true] %s14_s10 }
   0x4   :  { %s118_s12 = smov 16  }
   0x5   :  { %20 = dma.hbm_to_vmem [thread:$0]  %s13_s8, 256, %s15_s10, [#allocation3], %s117_s11, %s117_s11, %s118_s12  }
   0x6   :  { %112 = dma.done.wait [#allocation3], 1024  }
   0x7   :  { %113 = vsyncadd [#allocation3], 4294966272  ;;  %v25_v0 = vld [vmem:[#allocation2] sm:$0xff]  ;;  %v26_v1 = vld [vmem:[#allocation2 + $0x8] sm:$0xff] }
   0x8   :  { %v27_v2 = vld [vmem:[#allocation2 + $0x10] sm:$0xff]  ;;  %33 = vst [vmem:[#allocation5] sm:$0xff] %v25_v0  ;;  %v28_v3 = vld [vmem:[#allocation2 + $0x18] sm:$0xff]  ;;  %v29_v4 = vld [vmem:[#allocation2 + $0x20] sm:$0xff] }
   0x9   :  { %34 = vst [vmem:[#allocation5 + $0x8] sm:$0xff] %v26_v1  ;;  %v30_v5 = vld [vmem:[#allocation2 + $0x28] sm:$0xff]  ;;  %v31_v6 = vld [vmem:[#allocation2 + $0x30] sm:$0xff]  ;;  %v32_v7 = vld [vmem:[#allocation2 + $0x38] sm:$0xff] }
   0xa   :  { %35 = vst [vmem:[#allocation5 + $0x10] sm:$0xff] %v27_v2 }
   0xb   :  { %36 = vst [vmem:[#allocation5 + $0x18] sm:$0xff] %v28_v3 }
   0xc   :  { %37 = vst [vmem:[#allocation5 + $0x20] sm:$0xff] %v29_v4 }
   0xd   :  { %38 = vst [vmem:[#allocation5 + $0x28] sm:$0xff] %v30_v5 }
   0xe   :  { %39 = vst [vmem:[#allocation5 + $0x30] sm:$0xff] %v31_v6 }
   0xf   :  { %40 = vst [vmem:[#allocation5 + $0x38] sm:$0xff] %v32_v7 }
  0x10   :  { %44 = vsyncadd [#allocation4], 768  ;;  %s47_s14 = sshll.u32 %s143_s1, 4  ;;  %s119_s15 = smov [#allocation5]   ;;  %s48_s14 = int_to_ptr.hbm [resolvable:$true] %s47_s14 }
  0x11   :  { %s45_s16 = sshll.u32 %s119_s15, 4  ;;  %s46_s16 = int_to_ptr.vmem [resolvable:$true] %s45_s16 }
  0x12   :  { %53 = dma.vmem_to_hbm [thread:$0]  %s46_s16, 256, %s48_s14, [#allocation4], %s117_s11, %s117_s11, %s118_s12  }
  0x13   :  { %114 = dma.done.wait [#allocation4], 1024  }
  0x14   :  { %115 = vsyncadd [#allocation4], 4294966272 }
  0x15   :  { %58 = vsyncpa [#allocation3], 1 }
  0x16   :  { %59 = vsyncpa [#allocation4], 1 }

</bundles_post_ra>
